<compile_context>
chip_gen: v7x
topology: tpu7x:2x2x1
jax: 0.10.0
libtpu: 0.0.40
codegen_flags: <defaults>
</compile_context>

<pallas_src>
import functools

import jax
import jax.numpy as jnp
from jax.experimental import pallas as pl
from jax.experimental.pallas import tpu as pltpu


# ----------------------------- config ---------------------------------------
class Cfg:
    model_in = 8       # Conv1d in_channels
    cnn_out = 32       # Conv1d out_channels == FF output dim
    kernal_size = 3    # Conv1d kernel size (odd, so seq length is preserved)
    padding = 1        # Conv1d padding == (kernal_size - 1) // 2
    fc_hid = 64        # hidden dim of the feed-forward


# ----------------------------- kernel ---------------------------------------
def cnn_block_kernel(p_ref, wc_ref, bc_ref, wfu_ref, bfu_ref, w2_ref, b2_ref,
                     out_ref, wout_ref, *, hid):
    """One grid step == one chunk of (B*S) rows.

    p_ref   : (R, K*Cin)       im2col patches for this row chunk (compute dtype)
    wc_ref  : (K*Cin, Cout)    conv weight folded into one matmul (compute dtype)
    bc_ref  : (1, Cout)        conv bias (f32)
    wfu_ref : (Cout, H+Cout)   [feed_forward[0].W | weight_fc.W] fused (compute dtype)
    bfu_ref : (1, H+Cout)      [feed_forward[0].b | weight_fc.b] fused (f32)
    w2_ref  : (H, Cout), b2_ref: (1, Cout)   feed_forward[2]
    out_ref : (R, Cout)  f32   output
    wout_ref: (R, Cout)  f32   weighted_output
    """
    cd = wc_ref.dtype  # MXU operand dtype (bf16 in the fast path, f32 for checks)

    # --- Conv1d as a single matmul on im2col patches (f32 accumulate) ---
    conv = jnp.dot(p_ref[...], wc_ref[...],
                   preferred_element_type=jnp.float32) + bc_ref[...]

    residual = conv
    relu_cnn = jnp.maximum(conv, 0.0)

    # --- fused (feed_forward[0] | weight_fc) matmul on the shared LHS ---
    fused = jnp.dot(relu_cnn.astype(cd), wfu_ref[...],
                    preferred_element_type=jnp.float32) + bfu_ref[...]
    h = jnp.maximum(fused[:, :hid], 0.0)        # feed_forward hidden (ReLU)
    logits = fused[:, hid:]                     # weight_fc logits

    # --- feed_forward[2] + residual ---
    ff = jnp.dot(h.astype(cd), w2_ref[...],
                 preferred_element_type=jnp.float32) + b2_ref[...]
    output = residual + ff

    # --- softmax(dim=-1) * 10000 (exact reciprocal: approx error * 1e4 is not ok) ---
    m = jnp.max(logits, axis=-1, keepdims=True)
    e = jnp.exp(logits - m)
    denom = jnp.sum(e, axis=-1, keepdims=True)
    weight = e * pl.reciprocal(denom, approx=False) * 10000.0

    out_ref[...] = output.astype(out_ref.dtype)
    wout_ref[...] = (output * weight).astype(wout_ref.dtype)


# ----------------------------- wrapper ---------------------------------------
def _choose_row_chunk(rows, *, cap=1024, multiple=16):
    """Row-chunk size: multiple of 16 (bf16 sublane packing), <= cap.

    Tiny inputs: one chunk (no forced split of an overhead-dominated kernel).
    Large inputs: aim for >= 8 chunks so megacore / 2 TensorCores balance.
    """
    rounded = -(-rows // multiple) * multiple
    if rounded <= cap:
        return rounded
    target = -(-rows // 8)                    # ~8 chunks
    target = -(-target // multiple) * multiple
    return min(max(target, multiple), cap)


@functools.partial(jax.jit, static_argnames=("padding", "compute_dtype"))
def cnn_block_forward(x, conv_w, conv_b, w1, b1, w2, b2, wf, bf, *,
                      padding, compute_dtype=jnp.bfloat16):
    """x: (B, S, Cin) f32.  conv_w: (K, Cin, Cout).  Linears stored as (in, out)."""
    B, S, Cin = x.shape
    K, _, Cout = conv_w.shape
    H = w1.shape[1]
    cd = compute_dtype

    # --- wrapper-side im2col: (B*S, K*Cin); padding applied per batch element
    #     before flattening, so no cross-batch tap leakage.
    xp = jnp.pad(x, ((0, 0), (padding, padding), (0, 0)))
    patches = jnp.concatenate([xp[:, k:k + S, :] for k in range(K)], axis=-1)
    patches = patches.reshape(B * S, K * Cin).astype(cd)

    # --- fold / fuse weights in plain JAX (done once under jit) ---
    w_conv = conv_w.reshape(K * Cin, Cout).astype(cd)       # conv as one matmul
    w_fused = jnp.concatenate([w1, wf], axis=1).astype(cd)  # (Cout, H+Cout)
    b_fused = jnp.concatenate([b1, bf], axis=1).astype(jnp.float32)
    w2_c = w2.astype(cd)
    bc = conv_b.astype(jnp.float32)
    b2_c = b2.astype(jnp.float32)

    rows = B * S
    row_chunk = _choose_row_chunk(rows)
    n_chunks = -(-rows // row_chunk)
    padded_rows = n_chunks * row_chunk
    if padded_rows != rows:
        # Ragged tail only; avoided entirely when rows is a multiple of 16 & <= cap.
        patches = jnp.pad(patches, ((0, padded_rows - rows), (0, 0)))

    full2 = lambda r, c: pl.BlockSpec((r, c), lambda i: (0, 0))
    row_spec = lambda c: pl.BlockSpec((row_chunk, c), lambda i: (i, 0))

    grid_spec = pltpu.PrefetchScalarGridSpec(
        num_scalar_prefetch=0,
        grid=(n_chunks,),
        in_specs=[
            row_spec(K * Cin),          # patches (row-chunked)
            full2(K * Cin, Cout),       # conv weight
            full2(1, Cout),             # conv bias
            full2(Cout, H + Cout),      # fused w1|wf
            full2(1, H + Cout),         # fused b1|bf
            full2(H, Cout),             # feed_forward[2] W
            full2(1, Cout),             # feed_forward[2] b
        ],
        out_specs=[row_spec(Cout), row_spec(Cout)],
    )

    out_flat, wout_flat = pl.pallas_call(
        functools.partial(cnn_block_kernel, hid=H),
        out_shape=(jax.ShapeDtypeStruct((padded_rows, Cout), jnp.float32),
                   jax.ShapeDtypeStruct((padded_rows, Cout), jnp.float32)),
        grid_spec=grid_spec,
        compiler_params=pltpu.CompilerParams(dimension_semantics=("parallel",)),
    )(patches, w_conv, bc, w_fused, b_fused, w2_c, b2_c)

    output = out_flat[:rows].reshape(B, S, Cout)
    weighted = wout_flat[:rows].reshape(B, S, Cout)
    return output, weighted


# ----------------------------- pure-JAX reference -----------------------------
def reference_forward(x, conv_w, conv_b, w1, b1, w2, b2, wf, bf, padding,
                      compute_dtype=jnp.float32):
    """Plain-JAX reference.  compute_dtype=f32 is the exact PyTorch math;
    compute_dtype=bf16 mirrors the kernel's mixed-precision policy
    (bf16 matmul operands, f32 accumulation / bias / elementwise)."""
    B, S, Cin = x.shape
    K, _, Cout = conv_w.shape
    cd = compute_dtype
    xp = jnp.pad(x, ((0, 0), (padding, padding), (0, 0))).astype(cd)
    cw = conv_w.astype(cd)
    conv = jnp.zeros((B, S, Cout), jnp.float32)
    for k in range(K):
        conv = conv + jnp.einsum("bsi,ij->bsj", xp[:, k:k + S, :], cw[k],
                                 preferred_element_type=jnp.float32)
    conv = conv + conv_b[0]
    residual = conv
    r = jnp.maximum(conv, 0.0)
    rc = r.astype(cd)
    h = jnp.maximum(jnp.einsum("bsi,ij->bsj", rc, w1.astype(cd),
                               preferred_element_type=jnp.float32) + b1[0], 0.0)
    ff = jnp.einsum("bsi,ij->bsj", h.astype(cd), w2.astype(cd),
                    preferred_element_type=jnp.float32) + b2[0]
    output = residual + ff
    logits = jnp.einsum("bsi,ij->bsj", rc, wf.astype(cd),
                        preferred_element_type=jnp.float32) + bf[0]
    weight = jax.nn.softmax(logits, axis=-1) * 10000.0
    return output, output * weight


# ----------------------------- main -------------------------------------------
if __name__ == "__main__":
    cfg = Cfg()
    B, S = 2, 16
    Cin, Cout, K, P, H = cfg.model_in, cfg.cnn_out, cfg.kernal_size, cfg.padding, cfg.fc_hid

    key = jax.random.PRNGKey(0)
    keys = jax.random.split(key, 10)

    x = jax.random.normal(keys[0], (B, S, Cin), jnp.float32)

    # Conv1d weight (PyTorch shape (Cout, Cin, K)) stored per-tap as (K, Cin, Cout).
    conv_w = 0.1 * jax.random.normal(keys[1], (K, Cin, Cout), jnp.float32)
    conv_b = 0.1 * jax.random.normal(keys[2], (1, Cout), jnp.float32)
    # Linear weights stored pre-transposed as (in, out) so the kernel computes x @ W + b.
    w1 = 0.1 * jax.random.normal(keys[3], (Cout, H), jnp.float32)
    b1 = 0.1 * jax.random.normal(keys[4], (1, H), jnp.float32)
    w2 = 0.1 * jax.random.normal(keys[5], (H, Cout), jnp.float32)
    b2 = 0.1 * jax.random.normal(keys[6], (1, Cout), jnp.float32)
    wf = 0.1 * jax.random.normal(keys[7], (Cout, Cout), jnp.float32)
    bf = 0.1 * jax.random.normal(keys[8], (1, Cout), jnp.float32)

    args = (x, conv_w, conv_b, w1, b1, w2, b2, wf, bf)

    # --- full-f32 path: tight check against the exact PyTorch math ---
    out32, wgt32 = cnn_block_forward(*args, padding=P, compute_dtype=jnp.float32)
    jax.block_until_ready((out32, wgt32))
    ref_out32, ref_wgt32 = reference_forward(*args, P, compute_dtype=jnp.float32)
    assert jnp.allclose(out32, ref_out32, atol=1e-4, rtol=1e-4)
    assert jnp.allclose(wgt32, ref_wgt32, atol=5e-3, rtol=1e-4)

    # --- bf16 fast path: check against a reference with the same precision policy ---
    out16, wgt16 = cnn_block_forward(*args, padding=P, compute_dtype=jnp.bfloat16)
    jax.block_until_ready((out16, wgt16))
    ref_out16, ref_wgt16 = reference_forward(*args, P, compute_dtype=jnp.bfloat16)
    assert jnp.allclose(out16, ref_out16, atol=1e-2, rtol=1e-2)
    assert jnp.allclose(wgt16, ref_wgt16, atol=1.0, rtol=1e-2)

    print("KERNEL_OK")
</pallas_src>

<mosaic_0001>
module attributes {stable_mosaic.version = 11 : i64} {
  func.func @cnn_block_kernel(%arg0: i32, %arg1: memref<32x24xf32, #tpu.memory_space<vmem>>, %arg2: memref<24x32xf32, #tpu.memory_space<vmem>>, %arg3: memref<1x32xf32, #tpu.memory_space<vmem>>, %arg4: memref<32x96xf32, #tpu.memory_space<vmem>>, %arg5: memref<1x96xf32, #tpu.memory_space<vmem>>, %arg6: memref<64x32xf32, #tpu.memory_space<vmem>>, %arg7: memref<1x32xf32, #tpu.memory_space<vmem>>, %arg8: memref<32x32xf32, #tpu.memory_space<vmem>>, %arg9: memref<32x32xf32, #tpu.memory_space<vmem>>) attributes {dimension_semantics = [#tpu.dimension_semantics<parallel>], iteration_bounds = array<i64: 1>, scalar_prefetch = 0 : i64, scratch_operands = 0 : i64, tpu.core_type = #tpu.core_type<tc>, window_params = [{transform_indices = @transform_0, window_bounds = array<i64: 32, 24>}, {pipeline_mode = #tpu.pipeline_mode<synchronous>, transform_indices = @transform_1, window_bounds = array<i64: 24, 32>}, {pipeline_mode = #tpu.pipeline_mode<synchronous>, transform_indices = @transform_2, window_bounds = array<i64: 1, 32>}, {pipeline_mode = #tpu.pipeline_mode<synchronous>, transform_indices = @transform_3, window_bounds = array<i64: 32, 96>}, {pipeline_mode = #tpu.pipeline_mode<synchronous>, transform_indices = @transform_4, window_bounds = array<i64: 1, 96>}, {pipeline_mode = #tpu.pipeline_mode<synchronous>, transform_indices = @transform_5, window_bounds = array<i64: 64, 32>}, {pipeline_mode = #tpu.pipeline_mode<synchronous>, transform_indices = @transform_6, window_bounds = array<i64: 1, 32>}, {transform_indices = @transform_7, window_bounds = array<i64: 32, 32>}, {transform_indices = @transform_8, window_bounds = array<i64: 32, 32>}]} {
    %c0 = arith.constant 0 : index
    %c0_0 = arith.constant 0 : index
    %0 = vector.load %arg1[%c0, %c0_0] : memref<32x24xf32, #tpu.memory_space<vmem>>, vector<32x24xf32>
    %c0_1 = arith.constant 0 : index
    %c0_2 = arith.constant 0 : index
    %1 = vector.load %arg2[%c0_1, %c0_2] : memref<24x32xf32, #tpu.memory_space<vmem>>, vector<24x32xf32>
    %cst = arith.constant dense<0.000000e+00> : vector<32x32xf32>
    %2 = tpu.matmul %0, %1, %cst {dimension_numbers = #tpu.dot_dimension_numbers<[1], [0], [0], [1], [0, 0, 1, 1], [], []>} : vector<32x24xf32>, vector<24x32xf32>, vector<32x32xf32> -> vector<32x32xf32>
    %c0_3 = arith.constant 0 : index
    %c0_4 = arith.constant 0 : index
    %3 = vector.load %arg3[%c0_3, %c0_4] : memref<1x32xf32, #tpu.memory_space<vmem>>, vector<1x32xf32>
    %4 = vector.broadcast %3 : vector<1x32xf32> to vector<32x32xf32>
    %5 = arith.addf %2, %4 : vector<32x32xf32>
    %cst_5 = arith.constant 0.000000e+00 : f32
    %6 = vector.broadcast %cst_5 : f32 to vector<32x32xf32>
    %7 = arith.maximumf %5, %6 : vector<32x32xf32>
    %c0_6 = arith.constant 0 : index
    %c0_7 = arith.constant 0 : index
    %8 = vector.load %arg4[%c0_6, %c0_7] : memref<32x96xf32, #tpu.memory_space<vmem>>, vector<32x96xf32>
    %cst_8 = arith.constant dense<0.000000e+00> : vector<32x96xf32>
    %9 = tpu.matmul %7, %8, %cst_8 {dimension_numbers = #tpu.dot_dimension_numbers<[1], [0], [0], [1], [0, 0, 1, 1], [], []>} : vector<32x32xf32>, vector<32x96xf32>, vector<32x96xf32> -> vector<32x96xf32>
    %c0_9 = arith.constant 0 : index
    %c0_10 = arith.constant 0 : index
    %10 = vector.load %arg5[%c0_9, %c0_10] : memref<1x96xf32, #tpu.memory_space<vmem>>, vector<1x96xf32>
    %11 = vector.broadcast %10 : vector<1x96xf32> to vector<32x96xf32>
    %12 = arith.addf %9, %11 : vector<32x96xf32>
    %13 = vector.extract_strided_slice %12 {offsets = [0, 0], sizes = [32, 64], strides = [1, 1]} : vector<32x96xf32> to vector<32x64xf32>
    %cst_11 = arith.constant 0.000000e+00 : f32
    %14 = vector.broadcast %cst_11 : f32 to vector<32x64xf32>
    %15 = arith.maximumf %13, %14 : vector<32x64xf32>
    %16 = vector.extract_strided_slice %12 {offsets = [0, 64], sizes = [32, 32], strides = [1, 1]} : vector<32x96xf32> to vector<32x32xf32>
    %c0_12 = arith.constant 0 : index
    %c0_13 = arith.constant 0 : index
    %17 = vector.load %arg6[%c0_12, %c0_13] : memref<64x32xf32, #tpu.memory_space<vmem>>, vector<64x32xf32>
    %cst_14 = arith.constant dense<0.000000e+00> : vector<32x32xf32>
    %18 = tpu.matmul %15, %17, %cst_14 {dimension_numbers = #tpu.dot_dimension_numbers<[1], [0], [0], [1], [0, 0, 1, 1], [], []>} : vector<32x64xf32>, vector<64x32xf32>, vector<32x32xf32> -> vector<32x32xf32>
    %c0_15 = arith.constant 0 : index
    %c0_16 = arith.constant 0 : index
    %19 = vector.load %arg7[%c0_15, %c0_16] : memref<1x32xf32, #tpu.memory_space<vmem>>, vector<1x32xf32>
    %20 = vector.broadcast %19 : vector<1x32xf32> to vector<32x32xf32>
    %21 = arith.addf %18, %20 : vector<32x32xf32>
    %22 = arith.addf %5, %21 : vector<32x32xf32>
    %cst_17 = arith.constant dense<0xFF800000> : vector<32xf32>
    %23 = vector.multi_reduction <maximumf>, %16, %cst_17 [1] : vector<32x32xf32> to vector<32xf32>
    %24 = vector.shape_cast %23 : vector<32xf32> to vector<32x1xf32>
    %25 = vector.broadcast %24 : vector<32x1xf32> to vector<32x32xf32>
    %26 = arith.subf %16, %25 : vector<32x32xf32>
    %27 = math.exp %26 : vector<32x32xf32>
    %cst_18 = arith.constant dense<0.000000e+00> : vector<32xf32>
    %28 = vector.multi_reduction <add>, %27, %cst_18 [1] : vector<32x32xf32> to vector<32xf32>
    %29 = vector.shape_cast %28 : vector<32xf32> to vector<32x1xf32>
    %30 = tpu.reciprocal %29 : vector<32x1xf32> -> vector<32x1xf32>
    %31 = vector.broadcast %30 : vector<32x1xf32> to vector<32x32xf32>
    %32 = arith.mulf %27, %31 : vector<32x32xf32>
    %cst_19 = arith.constant 1.000000e+04 : f32
    %33 = vector.broadcast %cst_19 : f32 to vector<32x32xf32>
    %34 = arith.mulf %32, %33 : vector<32x32xf32>
    %c0_20 = arith.constant 0 : index
    %c0_21 = arith.constant 0 : index
    %35 = vector.load %arg8[%c0_20, %c0_21] : memref<32x32xf32, #tpu.memory_space<vmem>>, vector<32x32xf32>
    tpu.vector_store %arg8[%c0_20, %c0_21], %22 {strides = array<i32>} : memref<32x32xf32, #tpu.memory_space<vmem>>, vector<32x32xf32>,
    %36 = arith.mulf %22, %34 : vector<32x32xf32>
    %c0_22 = arith.constant 0 : index
    %c0_23 = arith.constant 0 : index
    %37 = vector.load %arg9[%c0_22, %c0_23] : memref<32x32xf32, #tpu.memory_space<vmem>>, vector<32x32xf32>
    tpu.vector_store %arg9[%c0_22, %c0_23], %36 {strides = array<i32>} : memref<32x32xf32, #tpu.memory_space<vmem>>, vector<32x32xf32>,
    return
  }
  func.func @transform_0(%arg0: i32) -> (i32, i32) {
    %c0_i32 = arith.constant 0 : i32
    %c0_i32_0 = arith.constant 0 : i32
    return %arg0, %c0_i32 : i32, i32
  }
  func.func @transform_1(%arg0: i32) -> (i32, i32) {
    %c0_i32 = arith.constant 0 : i32
    %c0_i32_0 = arith.constant 0 : i32
    %c0_i32_1 = arith.constant 0 : i32
    return %c0_i32, %c0_i32_0 : i32, i32
  }
  func.func @transform_2(%arg0: i32) -> (i32, i32) {
    %c0_i32 = arith.constant 0 : i32
    %c0_i32_0 = arith.constant 0 : i32
    %c0_i32_1 = arith.constant 0 : i32
    return %c0_i32, %c0_i32_0 : i32, i32
  }
  func.func @transform_3(%arg0: i32) -> (i32, i32) {
    %c0_i32 = arith.constant 0 : i32
    %c0_i32_0 = arith.constant 0 : i32
    %c0_i32_1 = arith.constant 0 : i32
    return %c0_i32, %c0_i32_0 : i32, i32
  }
  func.func @transform_4(%arg0: i32) -> (i32, i32) {
    %c0_i32 = arith.constant 0 : i32
    %c0_i32_0 = arith.constant 0 : i32
    %c0_i32_1 = arith.constant 0 : i32
    return %c0_i32, %c0_i32_0 : i32, i32
  }
  func.func @transform_5(%arg0: i32) -> (i32, i32) {
    %c0_i32 = arith.constant 0 : i32
    %c0_i32_0 = arith.constant 0 : i32
    %c0_i32_1 = arith.constant 0 : i32
    return %c0_i32, %c0_i32_0 : i32, i32
  }
  func.func @transform_6(%arg0: i32) -> (i32, i32) {
    %c0_i32 = arith.constant 0 : i32
    %c0_i32_0 = arith.constant 0 : i32
    %c0_i32_1 = arith.constant 0 : i32
    return %c0_i32, %c0_i32_0 : i32, i32
  }
  func.func @transform_7(%arg0: i32) -> (i32, i32) {
    %c0_i32 = arith.constant 0 : i32
    %c0_i32_0 = arith.constant 0 : i32
    return %arg0, %c0_i32 : i32, i32
  }
  func.func @transform_8(%arg0: i32) -> (i32, i32) {
    %c0_i32 = arith.constant 0 : i32
    %c0_i32_0 = arith.constant 0 : i32
    return %arg0, %c0_i32 : i32, i32
  }
}

</mosaic_0001>

<bundles_post_ra>
// kernel: cnn_block_forward.1
= control target key start
LH: loop header
LB: loop body
LE: loop exit
PB: predicated region body
PF: predicated region fallthrough
CT: control target
= control target key end

     0   :  { %14 = vsyncpa [#allocation3], 0  ;;  %vm44_vm0 = vcmask 195584   ;;  %s910_s0 = inlined_call_operand.vmem [shape: f32[32,24], index: 0, kind: input, shape index: {}]   ;;  %s911_s1 = inlined_call_operand.vmem [shape: f32[24,32], index: 1, kind: input, shape index: {}]   ;;  %s912_s2 = inlined_call_operand.vmem [shape: f32[1,32], index: 2, kind: input, shape index: {}]   ;;  %s913_s3 = inlined_call_operand.vmem [shape: f32[32,96], index: 3, kind: input, shape index: {}]   ;;  %s914_s4 = inlined_call_operand.vmem [shape: f32[1,96], index: 4, kind: input, shape index: {}]   ;;  %s915_s5 = inlined_call_operand.vmem [shape: f32[64,32], index: 5, kind: input, shape index: {}]   ;;  %s916_s6 = inlined_call_operand.vmem [shape: f32[1,32], index: 6, kind: input, shape index: {}]   ;;  %s917_s7 = inlined_call_operand.hbm [shape: f32[32,32], index: 7, kind: output, shape index: {0}]   ;;  %s918_s8 = inlined_call_operand.hbm [shape: f32[32,32], index: 8, kind: output, shape index: {1}]  }
   0x1   :  { %v34_v0 = vld [vmem:[%s911_s1] sm:$0xff]  ;;  %v35_v1 = vld [vmem:[%s911_s1 + $0x8] sm:$0xff]  ;;  %v36_v4 = vld [vmem:[%s911_s1 + $0x10] sm:$0xff] }
   0x2   :  { %v591_v2 = vpack.c.bf16 %v35_v1, %v34_v0  ;;  %v30_v3 = vld [vmem:[%s910_s0] sm:$0xff]  ;;  %v147_v6 = vld [vmem:[%s913_s3 + $0x8] sm:$0xff] }
   0x3   :  { %549 = vmatprep.mubr.msk.f32.mxu1 %vm44_vm0, %v30_v3  ;;  %v146_v5 = vld [vmem:[%s913_s3] sm:$0xff] }
   0x4   :  { %592 = vmatprep.subr.bf16.mxu1 %v591_v2 }
   0x5   :  { %15 = vsyncpa [#allocation5], 0  ;;  %594 = vmatpush3.bf16.msra.mxu1 %v591_v2  ;;  %v595_v7 = vpack.c.bf16 %v147_v6, %v146_v5  ;;  %v31_v8 = vld [vmem:[%s910_s0 + $0x8] sm:$0xff]  ;;  %v32_v9 = vld [vmem:[%s910_s0 + $0x10] sm:$0xff]  ;;  %vm157_vm1 = vcmask 261120   ;;  %vm376_vm2 = vcmask 785920  }
   0x6   :  { %547 = vmatprep.subr.mxu1 %v36_v4  ;;  %v33_v10 = vld [vmem:[%s910_s0 + $0x18] sm:$0xff]  ;;  %v148_v11 = vld [vmem:[%s913_s3 + $0x10] sm:$0xff]  ;;  %v259_v14 = vld [vmem:[%s915_s5] sm:$0xff]  ;;  %vm274_vm3 = vcmask 523264  }
   0x7   :  { %v149_v12 = vld [vmem:[%s913_s3 + $0x18] sm:$0xff]  ;;  %v260_v15 = vld [vmem:[%s915_s5 + $0x8] sm:$0xff]  ;;  %v261_v16 = vld [vmem:[%s915_s5 + $0x10] sm:$0xff] }
   0x8   :  { %v599_v13 = vpack.c.bf16 %v149_v12, %v148_v11  ;;  %v603_v17 = vpack.c.bf16 %v260_v15, %v259_v14  ;;  %v262_v18 = vld [vmem:[%s915_s5 + $0x18] sm:$0xff]  ;;  %v263_v20 = vld [vmem:[%s915_s5 + $0x20] sm:$0xff]  ;;  %v264_v21 = vld [vmem:[%s915_s5 + $0x28] sm:$0xff] }
   0x9   :  { %548 = vmatpush3.msra.mxu1 %v36_v4  ;;  %v607_v19 = vpack.c.bf16 %v262_v18, %v261_v16  ;;  %v611_v22 = vpack.c.bf16 %v264_v21, %v263_v20  ;;  %v501_v23 = vld [vmem:[%s912_s2] ss:$0 sm:$0xff]  ;;  %v265_v36 = vld [vmem:[%s915_s5 + $0x30] sm:$0xff]  ;;  %v266_v37 = vld [vmem:[%s915_s5 + $0x38] sm:$0xff] }
   0xa   :  { %550 = vmatmul.mubr.msk.f32.vlgmr.msra.gmra.mrb[0].mxu1 %vm44_vm0, %v31_v8  ;;  %596 = vmatprep.subr.bf16.mxu1 %v595_v7  ;;  %v615_v38 = vpack.c.bf16 %v266_v37, %v265_v36  ;;  %v506_v39 = vld [vmem:[%s914_s4] ss:$0 sm:$0xff]  ;;  %s688_s4 = smov 64  }
   0xb   :  { %552 = vmatprep.mubr.msk.f32.mxu1 %vm44_vm0, %v32_v9  ;;  %598 = vmatpush3.bf16.msra.mxu1 %v595_v7  ;;  %v511_v8 = vld [vmem:[%s916_s6] ss:$0 sm:$0xff]  ;;  %s689_s6 = smov [#allocation2]  }
   0xc   :  { %600 = vmatprep.subr.bf16.mxu1 %v599_v13  ;;  %604 = vmatprep.subr.bf16.mxu0 %v603_v17  ;;  %s474_s21 = sshll.u32 %s689_s6, 4  ;;  %s475_s21 = int_to_ptr.vmem [resolvable:$true] %s474_s21 }
   0xd   :  { %606 = vmatpush3.bf16.msra.mxu0 %v603_v17  ;;  %s640_s22 = scalar_lea.vmem %s475_s21, 512  ;;  %p645_p1 = scmp.lt.s32.totalorder %s475_s21, %s475_s21 }
   0xe   :  { %553 = vmatmul.mubr.msk.f32.gmra.mrb[2].mxu1 %vm44_vm0, %v33_v10  ;;  %608 = vmatprep.subr.bf16.mxu0 %v607_v19  ;;  %p641_p0 = scmp.ne.s32.totalorder %s475_s21, %s640_s22  ;;  %p646_p2 = scmp.lt.s32.totalorder %s640_s22, %s640_s22 }
   0xf   :  { %602 = vmatpush3.bf16.msra.mxu1 %v599_v13 }
  0x10   :  { %p647_p3 = por %p646_p2, %p645_p1 }
  0x11   :  { %610 = vmatpush3.bf16.msra.mxu0 %v607_v19 }
  0x12   :  { %612 = vmatprep.subr.bf16.mxu0 %v611_v22  ;;  %p648_p4 = pnand %p647_p3, %p641_p0 }
  0x15   :  { %614 = vmatpush3.bf16.msra.mxu0 %v611_v22 }
  0x16   :  { %616 = vmatprep.subr.bf16.mxu0 %v615_v38 }
  0x19   :  { %618 = vmatpush3.bf16.msra.mxu0 %v615_v38 }
  0xdd   :  { %v551_v24 = vpop.f32.mrb[0].mxu1 }
  0xde   :  { %v796_v25 = vadd.f32 %v551_v24, %v501_v23  ;;  %v123_v26 = vpop.f32.mrb[1].mxu1 }
  0xdf   :  { %v798_v27 = vadd.f32 %v501_v23, %v123_v26 }
  0xe0   :  { %v143_v30 = vmax.f32 %v796_v25, 0.0 }
  0xe1   :  { %v142_v28 = vmax.f32 %v798_v27, 0.0  ;;  %v554_v29 = vpop.f32.mrb[2].mxu1 }
  0xe2   :  { %v802_v31 = vadd.f32 %v554_v29, %v501_v23  ;;  %v133_v32 = vpop.f32.mrb[3].mxu1 }
  0xe3   :  { %v804_v33 = vadd.f32 %v501_v23, %v133_v32  ;;  %563 = vmatprep.mubr.msk.f32.mxu1 %vm157_vm1, %v142_v28 }
  0xe4   :  { %v145_v34 = vmax.f32 %v802_v31, 0.0  ;;  %564 = vmatmul.mubr.msk.f32.vlgmr.msra.gmra.mrb[4].mxu1 %vm157_vm1, %v143_v30 }
  0xe5   :  { %v144_v35 = vmax.f32 %v804_v33, 0.0 }
  0xe7   :  { %566 = vmatprep.mubr.msk.f32.mxu1 %vm157_vm1, %v144_v35 }
  0xe8   :  { %567 = vmatmul.mubr.msk.f32.gmra.mrb[6].mxu1 %vm157_vm1, %v145_v34 }
 0x1b7   :  { %v565_v40 = vpop.f32.mrb[4].mxu1 }
 0x1b8   :  { %v242_v41 = vadd.f32 %v565_v40, %v506_v39  ;;  %v236_v42 = vpop.f32.mrb[5].mxu1 }
 0x1b9   :  { %v237_v43 = vadd.f32 %v506_v39, %v236_v42 }
 0x1ba   :  { %v256_v47 = vmax.f32 %v242_v41, 0.0  ;;  %v380_v54 = vsel %vm376_vm2, %v242_v41, -inf }
 0x1bb   :  { %v568_v44 = vpop.f32.mrb[6].mxu1  ;;  %v377_v45 = vsel %vm376_vm2, %v237_v43, -inf  ;;  %v255_v46 = vmax.f32 %v237_v43, 0.0 }
 0x1bc   :  { %v252_v48 = vadd.f32 %v568_v44, %v506_v39  ;;  %v246_v49 = vpop.f32.mrb[7].mxu1  ;;  %378 = vmax.xlane.f32.xlu0 %v377_v45 }
 0x1bd   :  { %v247_v50 = vadd.f32 %v506_v39, %v246_v49  ;;  %585 = vmatprep.mubr.msk.f32.mxu0 %vm274_vm3, %v255_v46 }
 0x1be   :  { %v258_v51 = vmax.f32 %v252_v48, 0.0  ;;  %586 = vmatmul.mubr.msk.f32.vlgmr.msra.gmra.mrb[0].mxu0 %vm274_vm3, %v256_v47  ;;  %v386_v55 = vsel %vm376_vm2, %v252_v48, -inf }
 0x1bf   :  { %v257_v52 = vmax.f32 %v247_v50, 0.0  ;;  %v383_v53 = vsel %vm376_vm2, %v247_v50, -inf }
 0x1c0   :  { %384 = vmax.xlane.f32.xlu1 %v383_v53  ;;  %381 = vmax.xlane.f32.xlu0 %v380_v54 }
 0x1c1   :  { %588 = vmatprep.mubr.msk.f32.mxu0 %vm274_vm3, %v257_v52 }
 0x1c2   :  { %589 = vmatmul.mubr.msk.f32.gmra.mrb[2].mxu0 %vm274_vm3, %v258_v51 }
 0x1c4   :  { %387 = vmax.xlane.f32.xlu1 %v386_v55 }
 0x249   :  { %v379_v56 = vpop.xlane.xlu0 %378 }
 0x24a   :  { %v389_v57 = vsub.f32 %v237_v43, %v379_v56 }
 0x24c   :  { %v393_v58 = vmul.f32 1.442695, %v389_v57 }
 0x24d   :  { %v385_v59 = vpop.xlane.xlu1 %384  ;;  %v382_v60 = vpop.xlane.xlu0 %381 }
 0x24e   :  { %624 = vpow2.f32 %v393_v58  ;;  %v390_v61 = vsub.f32 %v242_v41, %v382_v60  ;;  %v391_v62 = vsub.f32 %v247_v50, %v385_v59 }
 0x250   :  { %v395_v63 = vmul.f32 1.442695, %v390_v61  ;;  %v397_v1 = vmul.f32 1.442695, %v391_v62 }
 0x251   :  { %v388_v0 = vpop.xlane.xlu1 %387 }
 0x252   :  { %626 = vpow2.f32 %v395_v63  ;;  %v392_v2 = vsub.f32 %v252_v48, %v388_v0 }
 0x253   :  { %628 = vpow2.f32 %v397_v1 }
 0x254   :  { %v399_v3 = vmul.f32 1.442695, %v392_v2 }
 0x256   :  { %630 = vpow2.f32 %v399_v3 }
 0x258   :  { %v625_v4 = vpop.eup %624 }
 0x259   :  { %405 = vrot.lane.b32.xlu0 %v625_v4, %s688_s4 }
 0x25c   :  { %v627_v5 = vpop.eup %626 }
 0x25d   :  { %407 = vrot.lane.b32.xlu1 %v627_v5, %s688_s4  ;;  %v831_v6 = vpop.eup %628 }
 0x260   :  { %v835_v7 = vpop.eup %630 }
 0x261   :  { %409 = vrot.lane.b32.xlu1 %v831_v6, %s688_s4 }
 0x265   :  { %411 = vrot.lane.b32.xlu1 %v835_v7, %s688_s4 }
 0x291   :  { %v587_v9 = vpop.f32.mrb[0].mxu0 }
 0x292   :  { %v359_v10 = vadd.f32 %v587_v9, %v511_v8  ;;  %v353_v11 = vpop.f32.mrb[1].mxu0 }
 0x293   :  { %v354_v12 = vadd.f32 %v511_v8, %v353_v11 }
 0x294   :  { %v843_v13 = vadd.f32 %v359_v10, %v796_v25 }
 0x295   :  { %v590_v14 = vpop.f32.mrb[2].mxu0  ;;  %v846_v15 = vadd.f32 %v354_v12, %v798_v27 }
 0x296   :  { %v369_v16 = vadd.f32 %v590_v14, %v511_v8  ;;  %v363_v17 = vpop.f32.mrb[3].mxu0  ;;  %442 = vst.msk [vmem:[#allocation2 + $0x8] sm:$0xff] %vm157_vm1, %v843_v13 }
 0x297   :  { %v364_v18 = vadd.f32 %v511_v8, %v363_v17  ;;  %441 = vst.msk [vmem:[#allocation2] sm:$0xff] %vm157_vm1, %v846_v15 }
 0x298   :  { %v853_v19 = vadd.f32 %v369_v16, %v802_v31 }
 0x299   :  { %v856_v20 = vadd.f32 %v364_v18, %v804_v33 }
 0x29a   :  { %444 = vst.msk [vmem:[#allocation2 + $0x18] sm:$0xff] %vm157_vm1, %v853_v19 }
 0x29b   :  { %443 = vst.msk [vmem:[#allocation2 + $0x10] sm:$0xff] %vm157_vm1, %v856_v20 }
 0x2cb   :  { %v406_v21 = vpop.permute.xlu0 %405 }
 0x2cc   :  { %v417_v22 = vsel %vm157_vm1, %v406_v21, 0.0 }
 0x2cd   :  { %418 = vadd.xlane.f32.xlu0 %v417_v22 }
 0x2cf   :  { %v408_v23 = vpop.permute.xlu1 %407 }
 0x2d0   :  { %v420_v24 = vsel %vm157_vm1, %v408_v23, 0.0 }
 0x2d1   :  { %421 = vadd.xlane.f32.xlu1 %v420_v24 }
 0x2d3   :  { %v410_v25 = vpop.permute.xlu1 %409 }
 0x2d4   :  { %v423_v26 = vsel %vm157_vm1, %v410_v25, 0.0 }
 0x2d5   :  { %424 = vadd.xlane.f32.xlu0 %v423_v26 }
 0x2d7   :  { %v412_v27 = vpop.permute.xlu1 %411 }
 0x2d8   :  { %v426_v28 = vsel %vm157_vm1, %v412_v27, 0.0 }
 0x2d9   :  { %427 = vadd.xlane.f32.xlu0 %v426_v28 }
 0x35a   :  { %v419_v29 = vpop.xlane.xlu0 %418 }
 0x35b   :  { %632 = vrcp.f32 %v419_v29 }
 0x35e   :  { %v422_v30 = vpop.xlane.xlu1 %421 }
 0x35f   :  { %634 = vrcp.f32 %v422_v30 }
 0x362   :  { %v425_v31 = vpop.xlane.xlu0 %424 }
 0x363   :  { %636 = vrcp.f32 %v425_v31 }
 0x365   :  { %v633_v32 = vpop.eup %632 }
 0x366   :  { %v433_v33 = vmul.f32 %v633_v32, %v625_v4  ;;  %v428_v34 = vpop.xlane.xlu0 %427 }
 0x367   :  { %638 = vrcp.f32 %v428_v34 }
 0x368   :  { %v437_v35 = vmul.f32 10000.0, %v433_v33 }
 0x369   :  { %v635_v36 = vpop.eup %634 }
 0x36a   :  { %449 = vrot.lane.b32.xlu0 %v437_v35, %s688_s4  ;;  %v434_v37 = vmul.f32 %v635_v36, %v627_v5 }
 0x36c   :  { %v438_v38 = vmul.f32 10000.0, %v434_v37 }
 0x36d   :  { %v637_v39 = vpop.eup %636 }
 0x36e   :  { %651 = shalt.err (!%p648_p4)
}
 0x36f   :  { %s652_s25 = scalar_lea.hbm %s917_s7, 512 }
 0x370   :  { %p653_p5 = scmp.ne.s32.totalorder %s917_s7, %s652_s25  ;;  %p656_p6 = scmp.lt.u32.totalorder %s652_s25, %s917_s7 }
 0x372   :  { %p658_p7 = pnand %p656_p6, %p653_p5 }
 0x374   :  { %661 = shalt.err (!%p658_p7)
}
 0x375   :  { %s690_s29 = smov 128   ;;  %s691_s30 = smov 8   ;;  %451 = vrot.lane.b32.xlu1 %v438_v38, %s688_s4  ;;  %v435_v40 = vmul.f32 %v637_v39, %v831_v6  ;;  %v639_v42 = vpop.eup %638 }
 0x376   :  { %480 = dma.vmem_to_hbm [thread:$0]  %s475_s21, 512, %s917_s7, [#allocation3], %s690_s29, %s690_s29, %s691_s30   ;;  %v436_v43 = vmul.f32 %v639_v42, %v835_v7 }
 0x377   :  { %v439_v41 = vmul.f32 10000.0, %v435_v40  ;;  %s692_s7 = smov [#allocation4]  }
 0x378   :  { %v440_v44 = vmul.f32 10000.0, %v436_v43  ;;  %s486_s3 = sshll.u32 %s692_s7, 4  ;;  %s487_s3 = int_to_ptr.vmem [resolvable:$true] %s486_s3 }
 0x379   :  { %453 = vrot.lane.b32.xlu1 %v439_v41, %s688_s4  ;;  %s662_s11 = scalar_lea.vmem %s487_s3, 512  ;;  %p667_p9 = scmp.lt.s32.totalorder %s487_s3, %s487_s3 }
 0x37a   :  { %p663_p8 = scmp.ne.s32.totalorder %s487_s3, %s662_s11  ;;  %p668_p10 = scmp.lt.s32.totalorder %s662_s11, %s662_s11 }
 0x37c   :  { %p669_p11 = por %p668_p10, %p667_p9 }
 0x37d   :  { %455 = vrot.lane.b32.xlu1 %v440_v44, %s688_s4 }
 0x37e   :  { %p670_p12 = pnand %p669_p11, %p663_p8 }
 0x3dc   :  { %v450_v45 = vpop.permute.xlu0 %449 }
 0x3dd   :  { %v461_v46 = vmul.f32 %v450_v45, %v846_v15 }
 0x3df   :  { %465 = vst.msk [vmem:[#allocation4] sm:$0xff] %vm157_vm1, %v461_v46 }
 0x3e7   :  { %v452_v47 = vpop.permute.xlu1 %451 }
 0x3e8   :  { %v462_v48 = vmul.f32 %v452_v47, %v843_v13 }
 0x3ea   :  { %466 = vst.msk [vmem:[#allocation4 + $0x8] sm:$0xff] %vm157_vm1, %v462_v48 }
 0x3eb   :  { %v454_v49 = vpop.permute.xlu1 %453 }
 0x3ec   :  { %v463_v50 = vmul.f32 %v454_v49, %v856_v20 }
 0x3ee   :  { %467 = vst.msk [vmem:[#allocation4 + $0x10] sm:$0xff] %vm157_vm1, %v463_v50 }
 0x3ef   :  { %v456_v51 = vpop.permute.xlu1 %455 }
 0x3f0   :  { %v464_v52 = vmul.f32 %v456_v51, %v853_v19 }
 0x3f2   :  { %468 = vst.msk [vmem:[#allocation4 + $0x18] sm:$0xff] %vm157_vm1, %v464_v52 }
 0x3f3   :  { %673 = shalt.err (!%p670_p12)
}
 0x3f4   :  { %s674_s14 = scalar_lea.hbm %s918_s8, 512 }
 0x3f5   :  { %p675_p13 = scmp.ne.s32.totalorder %s918_s8, %s674_s14  ;;  %p678_p0 = scmp.lt.u32.totalorder %s674_s14, %s918_s8 }
 0x3f7   :  { %p680_p1 = pnand %p678_p0, %p675_p13 }
 0x3f9   :  { %683 = shalt.err (!%p680_p1)
}
 0x3fa   :  { %492 = dma.vmem_to_hbm [thread:$0]  %s487_s3, 512, %s918_s8, [#allocation5], %s690_s29, %s690_s29, %s691_s30  }
 0x3fb   :  { %684 = dma.done.wait [#allocation3], 512  }
 0x3fc   :  { %685 = vsyncadd [#allocation3], 4294966784 }
 0x3fd   :  { %686 = dma.done.wait [#allocation5], 512  }
 0x3fe   :  { %687 = vsyncadd [#allocation5], 4294966784 }
 0x3ff   :  { %499 = vsyncpa [#allocation3], 1 }
 0x400   :  { %500 = vsyncpa [#allocation5], 1 }

</bundles_post_ra>
